<compile_context>
chip_gen: v5e
topology: v5e:2x2
jax: 0.10.0
libtpu: 0.0.40
codegen_flags: <defaults>
</compile_context>

<pallas_src>
import jax
import jax.numpy as jnp
from jax.experimental import pallas as pl
from jax.experimental.pallas import tpu as pltpu


# ----------------------------------------------------------------------------
# Single-matrix kernel: one (7,7) tile, grid-less.
# ----------------------------------------------------------------------------
def mm_double_kernel(x_ref, o_ref):
    # One MXU matmul with f32 accumulation; the "+ t2" of the reference module
    # is an elementwise doubling done on the VPU (free here).
    x = x_ref[...]
    t = jnp.dot(x, x, preferred_element_type=jnp.float32)
    o_ref[...] = (t + t).astype(o_ref.dtype)


def mm_plus_mm(x):
    """(x @ x) + (x @ x) == 2 * (x @ x) as a single-tile Pallas kernel.

    x is tiny (7x7), so the full array is placed in VMEM as one block; using
    the full array dims satisfies the (8,128) tiling rule. No grid is used --
    launch + pipeline overhead would dwarf the actual math.
    """
    M, K = x.shape
    assert M == K, "x must be square for x @ x"
    N = K
    return pl.pallas_call(
        mm_double_kernel,
        out_shape=jax.ShapeDtypeStruct((M, N), x.dtype),
        in_specs=[pl.BlockSpec(memory_space=pltpu.MemorySpace.VMEM)],
        out_specs=pl.BlockSpec(memory_space=pltpu.MemorySpace.VMEM),
        cost_estimate=pl.CostEstimate(
            # One matmul (we double on the VPU instead of issuing a second).
            flops=2 * M * K * N,
            bytes_accessed=4 * (M * K + M * N),
            transcendentals=0,
        ),
    )(x)


# ----------------------------------------------------------------------------
# Batched kernel: amortize launch/DMA cost over B stacked 7x7 matrices.
# ----------------------------------------------------------------------------
def mm_double_batched_kernel(x_ref, o_ref):
    # x_ref: (bb, 7, 7) block. Batched MXU matmul, VPU doubling on the store.
    x = x_ref[...]
    t = jnp.einsum("bij,bjk->bik", x, x, preferred_element_type=jnp.float32)
    o_ref[...] = (t + t).astype(o_ref.dtype)


def mm_plus_mm_batched(xs, *, bb=8):
    """Batched forward: for each b, (xs[b] @ xs[b]) * 2.

    One pallas_call for the whole stack: grid over the batch axis with
    BlockSpec auto-pipelining (overlaps HBM<->VMEM DMA with the matmuls) and
    a parallel batch axis so v7x shards grid steps across both TensorCores.
    """
    B, M, K = xs.shape
    assert M == K, "each matrix must be square"
    assert B % bb == 0, "batch must be divisible by the block batch size"
    N = K
    return pl.pallas_call(
        mm_double_batched_kernel,
        out_shape=jax.ShapeDtypeStruct((B, M, N), xs.dtype),
        grid=(B // bb,),
        in_specs=[pl.BlockSpec((bb, M, K), lambda i: (i, 0, 0))],
        out_specs=pl.BlockSpec((bb, M, N), lambda i: (i, 0, 0)),
        compiler_params=pltpu.CompilerParams(
            dimension_semantics=("parallel",)),
        cost_estimate=pl.CostEstimate(
            flops=B * 2 * M * K * N,           # one matmul per matrix
            bytes_accessed=4 * B * (M * K + M * N),
            transcendentals=0,
        ),
    )(xs)


def init_unused_linear_params(key, in_features=7, out_features=3):
    # Deterministic init mirroring nn.Linear(7, 3) (unused in forward).
    kw, kb = jax.random.split(key)
    bound = 1.0 / jnp.sqrt(in_features)
    w = jax.random.uniform(kw, (out_features, in_features),
                           minval=-bound, maxval=bound, dtype=jnp.float32)
    b = jax.random.uniform(kb, (out_features,),
                           minval=-bound, maxval=bound, dtype=jnp.float32)
    return w, b


if __name__ == "__main__":
    key = jax.random.PRNGKey(0)
    k_x, k_b, k_lin = jax.random.split(key, 3)

    # Unused linear parameters (present in module __init__ only)
    _w, _b = init_unused_linear_params(k_lin)

    # --- Single-matrix path: input matching torch.randn(7, 7) ---------------
    x = jax.random.normal(k_x, (7, 7), dtype=jnp.float32)
    out = jax.block_until_ready(mm_plus_mm(x))
    ref = jnp.dot(x, x) + jnp.dot(x, x)
    assert out.shape == (7, 7)
    assert jnp.allclose(out, ref, atol=1e-4, rtol=1e-4)

    # --- Batched path: amortize launch cost over a small stack --------------
    B = 16
    xs = jax.random.normal(k_b, (B, 7, 7), dtype=jnp.float32)
    out_b = jax.block_until_ready(mm_plus_mm_batched(xs, bb=8))
    ref_b = 2.0 * jnp.einsum("bij,bjk->bik", xs, xs)
    assert out_b.shape == (B, 7, 7)
    assert jnp.allclose(out_b, ref_b, atol=1e-4, rtol=1e-4)

    print("KERNEL_OK")
</pallas_src>

<mosaic_0001>
module attributes {stable_mosaic.version = 11 : i64} {
  func.func @mm_double_kernel(%arg0: memref<7x7xf32, #tpu.memory_space<vmem>>, %arg1: memref<7x7xf32, #tpu.memory_space<vmem>>) attributes {dimension_semantics = [], scalar_prefetch = 0 : i64, scratch_operands = 0 : i64, tpu.core_type = #tpu.core_type<tc>} {
    %c0 = arith.constant 0 : index
    %c0_0 = arith.constant 0 : index
    %0 = vector.load %arg0[%c0, %c0_0] : memref<7x7xf32, #tpu.memory_space<vmem>>, vector<7x7xf32>
    %cst = arith.constant dense<0.000000e+00> : vector<7x7xf32>
    %1 = tpu.matmul %0, %0, %cst {dimension_numbers = #tpu.dot_dimension_numbers<[1], [0], [0], [1], [0, 0, 1, 1], [], []>} : vector<7x7xf32>, vector<7x7xf32>, vector<7x7xf32> -> vector<7x7xf32>
    %2 = arith.addf %1, %1 : vector<7x7xf32>
    %c0_1 = arith.constant 0 : index
    %c0_2 = arith.constant 0 : index
    %3 = vector.load %arg1[%c0_1, %c0_2] : memref<7x7xf32, #tpu.memory_space<vmem>>, vector<7x7xf32>
    tpu.vector_store %arg1[%c0_1, %c0_2], %2 {strides = array<i32>} : memref<7x7xf32, #tpu.memory_space<vmem>>, vector<7x7xf32>,
    return
  }
}

</mosaic_0001>

<bundles_post_ra>
// kernel: tpu_custom_call.1
= control target key start
LH: loop header
LB: loop body
LE: loop exit
PB: predicated region body
PF: predicated region fallthrough
CT: control target
= control target key end

     0   :  { %6 = vsyncpa [#allocation3], 0  ;;  %s145_s0 = inlined_call_operand.hbm [shape: f32[7,7], index: 0, kind: input, shape index: {}]   ;;  %s146_s1 = inlined_call_operand.hbm [shape: f32[7,7], index: 1, kind: output, shape index: {}]  }
   0x1   :  { %7 = vsyncpa [#allocation4], 0  ;;  %s13_s8 = sshll.u32 %s145_s0, 4  ;;  %s127_s9 = smov [#allocation2]   ;;  %s14_s8 = int_to_ptr.hbm [resolvable:$true] %s13_s8 }
   0x2   :  { %s15_s10 = sshll.u32 %s127_s9, 4  ;;  %s16_s10 = int_to_ptr.vmem [resolvable:$true] %s15_s10 }
   0x3   :  { %18 = dma.hbm_to_vmem [thread:$0]  %s14_s8, 128, %s16_s10, [#allocation3]  }
   0x4   :  { %123 = dma.done.wait [#allocation3], 128  }
   0x5   :  { %124 = vsyncadd [#allocation3], 4294967168  ;;  %vm28_vm0 = vcmask 1046528   ;;  %vm24_vm1 = vcmask 56320   ;;  %v23_v0 = vld [vmem:[#allocation2] sm:$0x7f] }
   0x6   :  { %71 = vmatpush.msk.msra.mxu0 %vm28_vm0, %v23_v0  ;;  %s128_s11 = smov [#allocation5]   ;;  %s61_s15 = sshll.u32 %s146_s1, 4  ;;  %vm52_vm2 = vcmask 55296   ;;  %s62_s15 = int_to_ptr.hbm [resolvable:$true] %s61_s15 }
   0x7   :  { %72 = vmatmul.msk.f32.vlgmr.msra.gmra.mxu0 %vm24_vm1, %v23_v0  ;;  %s59_s12 = sshll.u32 %s128_s11, 4  ;;  %s60_s12 = int_to_ptr.vmem [resolvable:$true] %s59_s12 }
  0x84   :  { %v48_v1 = vpop.f32.mrf.mxu0 }
  0x85   :  { %v51_v2 = vadd.f32 %v48_v1, %v48_v1 }
  0x87   :  { %53 = vst.msk [vmem:[#allocation5] sm:$0x7f] %vm52_vm2, %v51_v2 }
  0x88   :  { %64 = dma.vmem_to_hbm [thread:$0]  %s60_s12, 128, %s62_s15, [#allocation4]  }
  0x89   :  { %125 = dma.done.wait [#allocation4], 128  }
  0x8a   :  { %126 = vsyncadd [#allocation4], 4294967168 }
  0x8b   :  { %69 = vsyncpa [#allocation3], 1 }
  0x8c   :  { %70 = vsyncpa [#allocation4], 1 }

</bundles_post_ra>
